<compile_context>
chip_gen: v7x
topology: tpu7x:2x2x1
jax: 0.10.0
libtpu: 0.0.40
codegen_flags: <defaults>
</compile_context>

<pallas_src>
import functools
import math

import jax
import jax.numpy as jnp
from jax import lax
from jax.experimental import pallas as pl
from jax.experimental.pallas import tpu as pltpu


def _label_smoothing_kl_kernel(tgt_ref, logits_ref, partial_ref, *,
                               confidence, smoothing_value, batch_size, tile_b):
    i = pl.program_id(0)

    x = logits_ref[...]                                   # (TB, C) native dtype
    t = tgt_ref[...]                                      # (TB, 1) int32
    TB, C = x.shape

    # Row max in the native dtype (halves vld/VALU work for bf16 inputs).
    m = jnp.max(x, axis=-1, keepdims=True)                # (TB, 1)

    # Gather x at the target class with an iota == target select.  Exactly one
    # element per row survives, so summing the (mostly zero) row is exact; the
    # f32 cast afterwards is exact for bf16 values.
    cls_idx = lax.broadcasted_iota(jnp.int32, (TB, C), 1)
    x_t = jnp.sum(jnp.where(cls_idx == t, x, jnp.zeros((), x.dtype)),
                  axis=-1, keepdims=True).astype(jnp.float32)          # (TB, 1)

    # f32 passes: sum over classes, logsumexp.  (x - m) only feeds exp().
    xf = x.astype(jnp.float32)
    mf = m.astype(jnp.float32)
    sum_x = jnp.sum(xf, axis=-1, keepdims=True)                        # (TB, 1)
    se = jnp.sum(jnp.exp(xf - mf), axis=-1, keepdims=True)             # (TB, 1)
    lse_full = mf + jnp.log(se)                                        # (TB, 1)

    # sum_c (-log_probs[b, c]) = C * lse - sum_c x
    # -log_probs[b, target_b]  = lse - x_t
    neg_lp_sum = jnp.float32(C) * lse_full - sum_x
    neg_lp_t = lse_full - x_t

    # Cross term of the KL divergence per row:
    #   sum_c model_prob * (-log_probs)
    #     = smoothing * sum_c(-log q) + (confidence - smoothing) * (-log q at target)
    per_row = (jnp.float32(smoothing_value) * neg_lp_sum
               + jnp.float32(confidence - smoothing_value) * neg_lp_t)

    # Mask padded rows of a partial last batch tile.  Must stay a select
    # (NaN-safe w.r.t. garbage block fill) -- do not turn into a multiply.
    row = lax.broadcasted_iota(jnp.int32, (TB, 1), 0) + i * tile_b
    per_row = jnp.where(row < batch_size, per_row, 0.0)

    partial_ref[0, 0] = jnp.sum(per_row)


def _vmem_capacity_bytes():
    try:
        return int(pltpu.get_tpu_info().vmem_capacity_bytes)
    except Exception:
        return 64 * 1024 * 1024          # conservative (v7x) fallback


def _choose_tile_b(batch_size, num_classes, itemsize, vmem_cap):
    """Largest batch tile whose live VMEM set fits comfortably on this chip.

    Live set per batch row:
      2 double-buffered native-dtype logits rows         = 2 * C * itemsize
      ~4 full-width f32/int32 in-kernel temporaries      = 16 * C
    Budget ~75% of physical VMEM (~48 MiB on v7x, ~96 MiB on v5e/v6e).
    """
    per_row_live = num_classes * (2 * itemsize + 16)
    budget = int(vmem_cap * 0.75)
    sublane = {4: 8, 2: 16, 1: 32}.get(itemsize, 8)

    tb = budget // max(1, per_row_live)
    tb = min(tb, 2048)
    tb = (tb // sublane) * sublane
    tb = max(sublane, tb)
    if tb >= batch_size:
        return batch_size                 # block == full dim is always legal
    return tb


def label_smoothing_loss(output, target, *, label_size, label_smoothing=0.1,
                         tile_b=None):
    """output: (B, C) float32/bfloat16 logits; target: (B,) int class indices."""
    assert 0.0 < label_smoothing <= 1.0
    B, C = output.shape
    assert C == label_size
    smoothing_value = label_smoothing / (label_size - 1)
    confidence = 1.0 - label_smoothing

    # sum_c p * log p is the same for every row.  (Guarded 0*log0 for the
    # degenerate label_smoothing == 1.0 setting, where PyTorch would yield NaN.)
    def _xlogx(v):
        return v * math.log(v) if v > 0.0 else 0.0
    entropy_const = _xlogx(confidence) + (C - 1) * _xlogx(smoothing_value)

    itemsize = jnp.dtype(output.dtype).itemsize
    vmem_cap = _vmem_capacity_bytes()
    if tile_b is None:
        tile_b = _choose_tile_b(B, C, itemsize, vmem_cap)
    num_tiles = pl.cdiv(B, tile_b)

    kernel = functools.partial(
        _label_smoothing_kl_kernel,
        confidence=confidence,
        smoothing_value=smoothing_value,
        batch_size=B,
        tile_b=tile_b,
    )

    # VMEM limit derived from the same live-set estimate as the tile choice.
    tile_bytes = tile_b * C * itemsize
    live_est = 2 * tile_bytes + 16 * tile_b * C + (1 << 20)
    vmem_limit = int(min(vmem_cap, max(32 * 1024 * 1024, live_est)))

    partials = pl.pallas_call(
        kernel,
        out_shape=jax.ShapeDtypeStruct((num_tiles, 1), jnp.float32),
        grid=(num_tiles,),
        in_specs=[
            pl.BlockSpec((tile_b, 1), lambda i: (i, 0)),   # target (B, 1) int32
            pl.BlockSpec((tile_b, C), lambda i: (i, 0)),   # logits, native dtype
        ],
        out_specs=pl.BlockSpec((1, 1), lambda i: (i, 0),
                               memory_space=pltpu.MemorySpace.SMEM),
        compiler_params=pltpu.CompilerParams(
            dimension_semantics=("parallel",),     # independent per-tile partials
            vmem_limit_bytes=vmem_limit,
        ),
        cost_estimate=pl.CostEstimate(
            flops=5 * B * C,
            transcendentals=B * C,
            bytes_accessed=B * C * itemsize + B * 4 + num_tiles * 4,
        ),
    )(target.astype(jnp.int32).reshape(B, 1), output)

    # Finalize on the host side: batch-mean division and the constant
    # entropy term, applied exactly once.
    return jnp.sum(partials) / jnp.float32(B) + jnp.float32(entropy_const)


def _reference(output, target, *, label_size, label_smoothing=0.1):
    smoothing_value = label_smoothing / (label_size - 1)
    confidence = 1.0 - label_smoothing
    B, C = output.shape
    log_probs = jax.nn.log_softmax(output.astype(jnp.float32), axis=1)
    model_prob = jnp.full((B, C), smoothing_value, dtype=jnp.float32)
    model_prob = model_prob.at[jnp.arange(B), target].set(confidence)
    return jnp.sum(model_prob * (jnp.log(model_prob) - log_probs)) / B


if __name__ == "__main__":
    key = jax.random.PRNGKey(0)
    B, C = 8, 32  # batch_size x n_classes
    k1, k2, k3, k4 = jax.random.split(key, 4)
    logits_f32 = jax.random.normal(k1, (B, C), dtype=jnp.float32)
    target = jax.random.randint(k2, (B,), 0, C, dtype=jnp.int32)

    # f32 path, single tile.
    loss = label_smoothing_loss(logits_f32, target, label_size=C, label_smoothing=0.1)
    loss = jax.block_until_ready(loss)
    ref = _reference(logits_f32, target, label_size=C, label_smoothing=0.1)
    assert jnp.allclose(loss, ref, rtol=1e-5, atol=1e-5), (loss, ref)

    # bf16 path (logits kept in native dtype end-to-end; casts happen in-kernel).
    logits_bf16 = logits_f32.astype(jnp.bfloat16)
    loss_bf = label_smoothing_loss(logits_bf16, target, label_size=C, label_smoothing=0.1)
    loss_bf = jax.block_until_ready(loss_bf)
    ref_bf = _reference(logits_bf16, target, label_size=C, label_smoothing=0.1)
    assert jnp.allclose(loss_bf, ref_bf, rtol=1e-4, atol=1e-4), (loss_bf, ref_bf)

    # Multi-tile path with a partial last tile (exercises the per-tile partial
    # sums, the parallel grid axis and the padded-row mask).
    B2 = 20
    logits2 = jax.random.normal(k3, (B2, C), dtype=jnp.float32)
    target2 = jax.random.randint(k4, (B2,), 0, C, dtype=jnp.int32)
    loss2 = label_smoothing_loss(logits2, target2, label_size=C,
                                 label_smoothing=0.1, tile_b=8)
    loss2 = jax.block_until_ready(loss2)
    ref2 = _reference(logits2, target2, label_size=C, label_smoothing=0.1)
    assert jnp.allclose(loss2, ref2, rtol=1e-5, atol=1e-5), (loss2, ref2)

    print("KERNEL_OK")
</pallas_src>

<mosaic_0001>
module attributes {stable_mosaic.version = 11 : i64} {
  func.func @_label_smoothing_kl_kernel(%arg0: i32, %arg1: memref<8x1xi32, #tpu.memory_space<vmem>>, %arg2: memref<8x32xf32, #tpu.memory_space<vmem>>, %arg3: memref<1x1xf32, #tpu.memory_space<smem>>) attributes {dimension_semantics = [#tpu.dimension_semantics<parallel>], iteration_bounds = array<i64: 1>, scalar_prefetch = 0 : i64, scratch_operands = 0 : i64, tpu.core_type = #tpu.core_type<tc>, window_params = [{transform_indices = @transform_0, window_bounds = array<i64: 8, 1>}, {transform_indices = @transform_1, window_bounds = array<i64: 8, 32>}, {transform_indices = @transform_2, window_bounds = array<i64: 1, 1>}]} {
    %c0 = arith.constant 0 : index
    %c0_0 = arith.constant 0 : index
    %0 = vector.load %arg2[%c0, %c0_0] : memref<8x32xf32, #tpu.memory_space<vmem>>, vector<8x32xf32>
    %c0_1 = arith.constant 0 : index
    %c0_2 = arith.constant 0 : index
    %1 = vector.load %arg1[%c0_1, %c0_2] : memref<8x1xi32, #tpu.memory_space<vmem>>, vector<8x1xi32>
    %cst = arith.constant dense<0xFF800000> : vector<8xf32>
    %2 = vector.multi_reduction <maximumf>, %0, %cst [1] : vector<8x32xf32> to vector<8xf32>
    %3 = vector.shape_cast %2 : vector<8xf32> to vector<8x1xf32>
    %4 = tpu.iota {dimensions = array<i32: 1>} : vector<8x32xi32>
    %5 = vector.broadcast %1 : vector<8x1xi32> to vector<8x32xi32>
    %6 = arith.cmpi eq, %4, %5 : vector<8x32xi32>
    %cst_3 = arith.constant 0.000000e+00 : f32
    %7 = vector.broadcast %cst_3 : f32 to vector<8x32xf32>
    %8 = arith.select %6, %0, %7 : vector<8x32xi1>, vector<8x32xf32>
    %cst_4 = arith.constant dense<0.000000e+00> : vector<8xf32>
    %9 = vector.multi_reduction <add>, %8, %cst_4 [1] : vector<8x32xf32> to vector<8xf32>
    %10 = vector.shape_cast %9 : vector<8xf32> to vector<8x1xf32>
    %cst_5 = arith.constant dense<0.000000e+00> : vector<8xf32>
    %11 = vector.multi_reduction <add>, %0, %cst_5 [1] : vector<8x32xf32> to vector<8xf32>
    %12 = vector.shape_cast %11 : vector<8xf32> to vector<8x1xf32>
    %13 = vector.broadcast %3 : vector<8x1xf32> to vector<8x32xf32>
    %14 = arith.subf %0, %13 : vector<8x32xf32>
    %15 = math.exp %14 : vector<8x32xf32>
    %cst_6 = arith.constant dense<0.000000e+00> : vector<8xf32>
    %16 = vector.multi_reduction <add>, %15, %cst_6 [1] : vector<8x32xf32> to vector<8xf32>
    %17 = vector.shape_cast %16 : vector<8xf32> to vector<8x1xf32>
    %18 = math.log %17 : vector<8x1xf32>
    %19 = arith.addf %3, %18 : vector<8x1xf32>
    %cst_7 = arith.constant 3.200000e+01 : f32
    %20 = vector.broadcast %cst_7 : f32 to vector<8x1xf32>
    %21 = arith.mulf %20, %19 : vector<8x1xf32>
    %22 = arith.subf %21, %12 : vector<8x1xf32>
    %23 = arith.subf %19, %10 : vector<8x1xf32>
    %cst_8 = arith.constant 0.0032258064 : f32
    %24 = vector.broadcast %cst_8 : f32 to vector<8x1xf32>
    %25 = arith.mulf %24, %22 : vector<8x1xf32>
    %cst_9 = arith.constant 0.896774172 : f32
    %26 = vector.broadcast %cst_9 : f32 to vector<8x1xf32>
    %27 = arith.mulf %26, %23 : vector<8x1xf32>
    %28 = arith.addf %25, %27 : vector<8x1xf32>
    %29 = tpu.iota {dimensions = array<i32: 0>} : vector<8x1xi32>
    %c8_i32 = arith.constant 8 : i32
    %30 = arith.muli %arg0, %c8_i32 : i32
    %31 = vector.broadcast %30 : i32 to vector<8x1xi32>
    %32 = arith.addi %29, %31 : vector<8x1xi32>
    %c8_i32_10 = arith.constant 8 : i32
    %33 = vector.broadcast %c8_i32_10 : i32 to vector<8x1xi32>
    %34 = arith.cmpi slt, %32, %33 : vector<8x1xi32>
    %cst_11 = arith.constant 0.000000e+00 : f32
    %35 = vector.broadcast %cst_11 : f32 to vector<8x1xf32>
    %36 = arith.select %34, %28, %35 : vector<8x1xi1>, vector<8x1xf32>
    %37 = vector.shape_cast %36 : vector<8x1xf32> to vector<1x8x1xf32>
    %cst_12 = arith.constant dense<0.000000e+00> : vector<1xf32>
    %38 = vector.multi_reduction <add>, %37, %cst_12 [1, 2] : vector<1x8x1xf32> to vector<1xf32>
    %39 = vector.shape_cast %38 : vector<1xf32> to vector<1x1x1xf32>
    %40 = vector.extract %39[0, 0, 0] : f32 from vector<1x1x1xf32>
    %c0_13 = arith.constant 0 : index
    %c0_14 = arith.constant 0 : index
    %41 = memref.load %arg3[%c0_13, %c0_14] : memref<1x1xf32, #tpu.memory_space<smem>>
    memref.store %40, %arg3[%c0_13, %c0_14] : memref<1x1xf32, #tpu.memory_space<smem>>
    return
  }
  func.func @transform_0(%arg0: i32) -> (i32, i32) {
    %c0_i32 = arith.constant 0 : i32
    %c0_i32_0 = arith.constant 0 : i32
    return %arg0, %c0_i32 : i32, i32
  }
  func.func @transform_1(%arg0: i32) -> (i32, i32) {
    %c0_i32 = arith.constant 0 : i32
    %c0_i32_0 = arith.constant 0 : i32
    return %arg0, %c0_i32 : i32, i32
  }
  func.func @transform_2(%arg0: i32) -> (i32, i32) {
    %c0_i32 = arith.constant 0 : i32
    %c0_i32_0 = arith.constant 0 : i32
    return %arg0, %c0_i32 : i32, i32
  }
}

</mosaic_0001>

<bundles_post_ra>
// kernel: tpu_custom_call.1
= control target key start
LH: loop header
LB: loop body
LE: loop exit
PB: predicated region body
PF: predicated region fallthrough
CT: control target
= control target key end

     0   :  { %vm14_vm0 = vcmask 261120   ;;  %s139_s0 = inlined_call_operand.vmem [shape: s32[8,1], index: 0, kind: input, shape index: {}]   ;;  %s140_s1 = inlined_call_operand.vmem [shape: f32[8,32], index: 1, kind: input, shape index: {}]   ;;  %s141_s2 = inlined_call_operand.hbm [shape: f32[1,1], index: 2, kind: output, shape index: {}]  }
   0x1   :  { %v12_v0 = vld [vmem:[%s140_s1] sm:$0xff] }
   0x2   :  { %7 = vsyncpa [#allocation3], 0  ;;  %v15_v1 = vsel %vm14_vm0, %v12_v0, -inf  ;;  %v100_v2 = vmov 0   ;;  %v13_v3 = vld [vmem:[%s139_s0] sm:$0xff]  ;;  %v18_v7 = vlaneseq  ;;  %v28_v14 = vsel %vm14_vm0, %v12_v0, 0.0 }
   0x3   :  { %83 = vset.pattern.permute.xlu0 %v100_v2  ;;  %vm53_vm2 = vcmask 7168   ;;  %s88_s14 = scalar_lea.hbm %s141_s2, 16 }
   0x4   :  { %16 = vmax.xlane.f32.xlu0 %v15_v1  ;;  %v19_v8 = vand.u32 127, %v18_v7  ;;  %p89_p0 = scmp.ne.s32.totalorder %s141_s2, %s88_s14  ;;  %p92_p1 = scmp.lt.u32.totalorder %s88_s14, %s141_s2 }
   0x6   :  { %p94_p2 = pnand %p92_p1, %p89_p0 }
  0x1a   :  { %21 = vperm.xlu0 %83, %v13_v3  }
  0x91   :  { %v17_v4 = vpop.xlane.xlu0 %16 }
  0x92   :  { %v31_v5 = vsub.f32 %v12_v0, %v17_v4 }
  0x94   :  { %v32_v6 = vmul.f32 1.442695, %v31_v5 }
  0x96   :  { %84 = vpow2.f32 %v32_v6 }
  0x99   :  { %v22_v9 = vpop.permute.xlu0 %21 }
  0x9a   :  { %vm23_vm1 = vcmp.eq.s32.totalorder %v19_v8, %v22_v9 }
  0x9b   :  { %v24_v11 = vsel %vm23_vm1, %v12_v0, 0.0 }
  0x9c   :  { %v25_v13 = vsel %vm14_vm0, %v24_v11, 0.0 }
  0xa0   :  { %v85_v10 = vpop.eup %84 }
  0xa1   :  { %v34_v12 = vsel %vm14_vm0, %v85_v10, 0.0 }
  0xa2   :  { %35 = vadd.xlane.f32.xlu1 %v34_v12 }
  0xa6   :  { %26 = vadd.xlane.f32.xlu1 %v25_v13 }
  0xaa   :  { %29 = vadd.xlane.f32.xlu1 %v28_v14 }
 0x12f   :  { %v36_v15 = vpop.xlane.xlu1 %35 }
 0x130   :  { %86 = vlog2.f32 %v36_v15 }
 0x133   :  { %v27_v16 = vpop.xlane.xlu1 %26 }
 0x137   :  { %v30_v20 = vpop.xlane.xlu1 %29 }
 0x13a   :  { %v87_v17 = vpop.eup %86 }
 0x13b   :  { %v38_v18 = vmul.f32 0.6931472, %v87_v17 }
 0x13d   :  { %v39_v19 = vadd.f32 %v38_v18, %v17_v4 }
 0x13f   :  { %v42_v21 = vsub.f32 %v39_v19, %v27_v16  ;;  %v40_v22 = vmul.f32 32.0, %v39_v19 }
 0x141   :  { %v41_v23 = vsub.f32 %v40_v22, %v30_v20  ;;  %v44_v24 = vmul.f32 0.8967742, %v42_v21 }
 0x143   :  { %v43_v25 = vmul.f32 0.0032258064, %v41_v23 }
 0x145   :  { %v45_v26 = vadd.f32 %v44_v24, %v43_v25 }
 0x147   :  { %v54_v27 = vsel %vm53_vm2, %v45_v26, 0.0 }
 0x148   :  { %55 = vadd.xlane.f32.xlu1 %v54_v27 }
 0x1d5   :  { %v56_v28 = vpop.xlane.xlu1 %55 }
 0x1d6   :  { %v57_v29 = vrot.slane %v56_v28, 4 }
 0x1d8   :  { %v58_v30 = vadd.f32 %v57_v29, %v56_v28 }
 0x1da   :  { %v59_v31 = vrot.slane %v58_v30, 2 }
 0x1dc   :  { %v60_v32 = vadd.f32 %v59_v31, %v58_v30 }
 0x1de   :  { %v61_v33 = vrot.slane %v60_v32, 1 }
 0x1e0   :  { %v62_v34 = vadd.f32 %v61_v33, %v60_v32 }
 0x1e2   :  { %79 = vpush %v62_v34 }
 0x213   :  { %s80_s0 = spop %79 }
 0x214   :  { %65 = sst [smem:[#allocation2]] %s80_s0 }
 0x215   :  { %97 = shalt.err (!%p94_p2)
}
 0x216   :  { %s101_s19 = smov [#allocation2]  }
 0x217   :  { %73 = dma.smem_to_hbm %s101_s19, 16, %s141_s2, [#allocation3]  }
 0x218   :  { %98 = dma.done.wait [#allocation3], 16  }
 0x219   :  { %99 = vsyncadd [#allocation3], 4294967280 }
 0x21a   :  { %77 = sfence }
 0x21b   :  { %78 = vsyncpa [#allocation3], 1 }

</bundles_post_ra>
